<compile_context>
chip_gen: v7x
topology: tpu7x:2x2x1
jax: 0.10.0
libtpu: 0.0.40
codegen_flags: <defaults>
</compile_context>

<pallas_src>
import jax
import jax.numpy as jnp
from jax.experimental import pallas as pl
from jax.experimental.pallas import tpu as pltpu

LANE = 128


def _round_up(v, m):
    return ((v + m - 1) // m) * m


def _cdiv(a, b):
    return -(-a // b)


def mlp_kernel(x_ref, w1_ref, b1_ref, w2_ref, b2_ref, o_ref):
    # In-kernel bf16 cast of the f32 input tile (no wrapper-side cast pass).
    x_bf = x_ref[...].astype(jnp.bfloat16)
    # fc1 on the MXU, f32 accumulation.
    h = jnp.dot(x_bf, w1_ref[...], preferred_element_type=jnp.float32)
    # Bias + ReLU in f32 on the VPU (keep f32 elementwise for v5e).
    h = jnp.maximum(h + b1_ref[...], 0.0)
    # Dropout: eval-mode identity.
    # TODO(synk): training-mode dropout would use pltpu.prng_seed / prng_random_bits.
    # fc2: cast activations to bf16 only for the MXU pass; accumulate in f32.
    out = jnp.dot(h.astype(w2_ref.dtype), w2_ref[...],
                  preferred_element_type=jnp.float32)
    o_ref[...] = (out + b2_ref[...]).astype(o_ref.dtype)


def prepare_params(w1, b1, w2, b2):
    """One-time parameter prep: bf16 weights, f32 biases, lane-padded fc2."""
    H = w1.shape[1]
    C = w2.shape[1]
    C_pad = max(LANE, _round_up(C, LANE))
    w1_bf = w1.astype(jnp.bfloat16)
    w2_bf = jnp.zeros((H, C_pad), jnp.bfloat16).at[:, :C].set(w2.astype(jnp.bfloat16))
    b1_2d = b1.reshape(1, H).astype(jnp.float32)
    b2_2d = jnp.zeros((1, C_pad), jnp.float32).at[:, :C].set(b2.astype(jnp.float32))
    return w1_bf, b1_2d, w2_bf, b2_2d, C


def _choose_batch_tile(B, batch_tile):
    # Clamp/round user-supplied tile to a multiple of 16 (bf16 sublane packing;
    # also satisfies the (8,128) block-shape divisibility rule when grid > 1).
    batch_tile = max(16, _round_up(int(batch_tile), 16))
    n_tiles = _cdiv(B, batch_tile)
    # v7x: guarantee >=2 grid steps when there is enough work, so the
    # "parallel" batch axis actually uses both TensorCores.
    if n_tiles < 2 and B >= 256:
        n_tiles = 2
    # Pick bt that (nearly) divides B -> minimal last-tile padding waste.
    bt = _round_up(_cdiv(B, n_tiles), 16)
    # Don't overshoot a small batch by more than sublane rounding.
    bt = min(bt, max(8, _round_up(B, 8)))
    return bt


def mlp_classifier_forward(x, w1_bf, b1_2d, w2_bf, b2_2d, num_labels,
                           *, batch_tile=512):
    B, D_in = x.shape
    H = w1_bf.shape[1]
    C_pad = w2_bf.shape[1]

    bt = _choose_batch_tile(B, batch_tile)
    grid = _cdiv(B, bt)

    out_padded = pl.pallas_call(
        mlp_kernel,
        out_shape=jax.ShapeDtypeStruct((B, C_pad), jnp.float32),
        grid=(grid,),
        in_specs=[
            pl.BlockSpec((bt, D_in), lambda i: (i, 0)),   # x: tiled over batch (f32)
            pl.BlockSpec((D_in, H), lambda i: (0, 0)),    # w1: resident
            pl.BlockSpec((1, H), lambda i: (0, 0)),       # b1: resident
            pl.BlockSpec((H, C_pad), lambda i: (0, 0)),   # w2 (padded): resident
            pl.BlockSpec((1, C_pad), lambda i: (0, 0)),   # b2 (padded): resident
        ],
        out_specs=pl.BlockSpec((bt, C_pad), lambda i: (i, 0)),
        compiler_params=pltpu.CompilerParams(
            dimension_semantics=("parallel",),   # batch tiles across cores (v7x)
        ),
    )(x, w1_bf, b1_2d, w2_bf, b2_2d)

    return out_padded[:, :num_labels]


def reference_forward_bf16(x, w1, b1, w2, b2):
    """Reference with the same bf16 quantization / f32 accumulation scheme."""
    xb = x.astype(jnp.bfloat16)
    w1b = w1.astype(jnp.bfloat16)
    w2b = w2.astype(jnp.bfloat16)
    h = jnp.dot(xb, w1b, preferred_element_type=jnp.float32) + b1
    h = jnp.maximum(h, 0.0)
    return jnp.dot(h.astype(jnp.bfloat16), w2b,
                   preferred_element_type=jnp.float32) + b2


if __name__ == "__main__":
    input_size, hidden_size, num_labels = 768, 512, 5
    batch = 8

    key = jax.random.PRNGKey(0)
    kx, k1, kb1, k2, kb2 = jax.random.split(key, 5)

    x = jax.random.normal(kx, (batch, input_size), dtype=jnp.float32)

    # Deterministic parameter init (uniform, PyTorch-Linear-style bounds).
    bound1 = 1.0 / (input_size ** 0.5)
    w1 = jax.random.uniform(k1, (input_size, hidden_size),
                            minval=-bound1, maxval=bound1, dtype=jnp.float32)
    b1 = jax.random.uniform(kb1, (hidden_size,),
                            minval=-bound1, maxval=bound1, dtype=jnp.float32)
    bound2 = 1.0 / (hidden_size ** 0.5)
    w2 = jax.random.uniform(k2, (hidden_size, num_labels),
                            minval=-bound2, maxval=bound2, dtype=jnp.float32)
    b2 = jax.random.uniform(kb2, (num_labels,),
                            minval=-bound2, maxval=bound2, dtype=jnp.float32)

    w1_bf, b1_2d, w2_bf, b2_2d, C = prepare_params(w1, b1, w2, b2)

    # Primary run at the shipped small shape.
    out = mlp_classifier_forward(x, w1_bf, b1_2d, w2_bf, b2_2d, C)
    out = jax.block_until_ready(out)
    assert out.shape == (batch, num_labels)
    ref = reference_forward_bf16(x, w1, b1, w2, b2)
    assert jnp.allclose(out, ref, atol=2e-2, rtol=2e-2), "mismatch vs bf16 reference"

    # Secondary sanity check: multi-step grid with a ragged last tile.
    x2 = jax.random.normal(jax.random.PRNGKey(1), (40, input_size), dtype=jnp.float32)
    out2 = mlp_classifier_forward(x2, w1_bf, b1_2d, w2_bf, b2_2d, C, batch_tile=16)
    out2 = jax.block_until_ready(out2)
    ref2 = reference_forward_bf16(x2, w1, b1, w2, b2)
    assert out2.shape == (40, num_labels)
    assert jnp.allclose(out2, ref2, atol=2e-2, rtol=2e-2), "mismatch (multi-tile)"

    print("KERNEL_OK")
</pallas_src>

<mosaic_0001>
module attributes {stable_mosaic.version = 11 : i64} {
  func.func @mlp_kernel(%arg0: i32, %arg1: memref<8x768xf32, #tpu.memory_space<vmem>>, %arg2: memref<768x512xbf16, #tpu.memory_space<vmem>>, %arg3: memref<1x512xf32, #tpu.memory_space<vmem>>, %arg4: memref<512x128xbf16, #tpu.memory_space<vmem>>, %arg5: memref<1x128xf32, #tpu.memory_space<vmem>>, %arg6: memref<8x128xf32, #tpu.memory_space<vmem>>) attributes {dimension_semantics = [#tpu.dimension_semantics<parallel>], iteration_bounds = array<i64: 1>, scalar_prefetch = 0 : i64, scratch_operands = 0 : i64, tpu.core_type = #tpu.core_type<tc>, window_params = [{transform_indices = @transform_0, window_bounds = array<i64: 8, 768>}, {pipeline_mode = #tpu.pipeline_mode<synchronous>, transform_indices = @transform_1, window_bounds = array<i64: 768, 512>}, {pipeline_mode = #tpu.pipeline_mode<synchronous>, transform_indices = @transform_2, window_bounds = array<i64: 1, 512>}, {pipeline_mode = #tpu.pipeline_mode<synchronous>, transform_indices = @transform_3, window_bounds = array<i64: 512, 128>}, {pipeline_mode = #tpu.pipeline_mode<synchronous>, transform_indices = @transform_4, window_bounds = array<i64: 1, 128>}, {transform_indices = @transform_5, window_bounds = array<i64: 8, 128>}]} {
    %c0 = arith.constant 0 : index
    %c0_0 = arith.constant 0 : index
    %0 = vector.load %arg1[%c0, %c0_0] : memref<8x768xf32, #tpu.memory_space<vmem>>, vector<8x768xf32>
    %1 = arith.truncf %0 : vector<8x768xf32> to vector<8x768xbf16>
    %c0_1 = arith.constant 0 : index
    %c0_2 = arith.constant 0 : index
    %2 = vector.load %arg2[%c0_1, %c0_2] : memref<768x512xbf16, #tpu.memory_space<vmem>>, vector<768x512xbf16>
    %cst = arith.constant dense<0.000000e+00> : vector<8x512xf32>
    %3 = tpu.matmul %1, %2, %cst {dimension_numbers = #tpu.dot_dimension_numbers<[1], [0], [0], [1], [0, 0, 1, 1], [], []>} : vector<8x768xbf16>, vector<768x512xbf16>, vector<8x512xf32> -> vector<8x512xf32>
    %c0_3 = arith.constant 0 : index
    %c0_4 = arith.constant 0 : index
    %4 = vector.load %arg3[%c0_3, %c0_4] : memref<1x512xf32, #tpu.memory_space<vmem>>, vector<1x512xf32>
    %5 = vector.broadcast %4 : vector<1x512xf32> to vector<8x512xf32>
    %6 = arith.addf %3, %5 : vector<8x512xf32>
    %cst_5 = arith.constant 0.000000e+00 : f32
    %7 = vector.broadcast %cst_5 : f32 to vector<8x512xf32>
    %8 = arith.maximumf %6, %7 : vector<8x512xf32>
    %9 = arith.truncf %8 : vector<8x512xf32> to vector<8x512xbf16>
    %c0_6 = arith.constant 0 : index
    %c0_7 = arith.constant 0 : index
    %10 = vector.load %arg4[%c0_6, %c0_7] : memref<512x128xbf16, #tpu.memory_space<vmem>>, vector<512x128xbf16>
    %cst_8 = arith.constant dense<0.000000e+00> : vector<8x128xf32>
    %11 = tpu.matmul %9, %10, %cst_8 {dimension_numbers = #tpu.dot_dimension_numbers<[1], [0], [0], [1], [0, 0, 1, 1], [], []>} : vector<8x512xbf16>, vector<512x128xbf16>, vector<8x128xf32> -> vector<8x128xf32>
    %c0_9 = arith.constant 0 : index
    %c0_10 = arith.constant 0 : index
    %12 = vector.load %arg5[%c0_9, %c0_10] : memref<1x128xf32, #tpu.memory_space<vmem>>, vector<1x128xf32>
    %13 = vector.broadcast %12 : vector<1x128xf32> to vector<8x128xf32>
    %14 = arith.addf %11, %13 : vector<8x128xf32>
    %c0_11 = arith.constant 0 : index
    %c0_12 = arith.constant 0 : index
    %15 = vector.load %arg6[%c0_11, %c0_12] : memref<8x128xf32, #tpu.memory_space<vmem>>, vector<8x128xf32>
    tpu.vector_store %arg6[%c0_11, %c0_12], %14 {strides = array<i32>} : memref<8x128xf32, #tpu.memory_space<vmem>>, vector<8x128xf32>,
    return
  }
  func.func @transform_0(%arg0: i32) -> (i32, i32) {
    %c0_i32 = arith.constant 0 : i32
    %c0_i32_0 = arith.constant 0 : i32
    return %arg0, %c0_i32 : i32, i32
  }
  func.func @transform_1(%arg0: i32) -> (i32, i32) {
    %c0_i32 = arith.constant 0 : i32
    %c0_i32_0 = arith.constant 0 : i32
    %c0_i32_1 = arith.constant 0 : i32
    return %c0_i32, %c0_i32_0 : i32, i32
  }
  func.func @transform_2(%arg0: i32) -> (i32, i32) {
    %c0_i32 = arith.constant 0 : i32
    %c0_i32_0 = arith.constant 0 : i32
    %c0_i32_1 = arith.constant 0 : i32
    return %c0_i32, %c0_i32_0 : i32, i32
  }
  func.func @transform_3(%arg0: i32) -> (i32, i32) {
    %c0_i32 = arith.constant 0 : i32
    %c0_i32_0 = arith.constant 0 : i32
    %c0_i32_1 = arith.constant 0 : i32
    return %c0_i32, %c0_i32_0 : i32, i32
  }
  func.func @transform_4(%arg0: i32) -> (i32, i32) {
    %c0_i32 = arith.constant 0 : i32
    %c0_i32_0 = arith.constant 0 : i32
    %c0_i32_1 = arith.constant 0 : i32
    return %c0_i32, %c0_i32_0 : i32, i32
  }
  func.func @transform_5(%arg0: i32) -> (i32, i32) {
    %c0_i32 = arith.constant 0 : i32
    %c0_i32_0 = arith.constant 0 : i32
    return %arg0, %c0_i32 : i32, i32
  }
}

</mosaic_0001>

<bundles_post_ra>
// kernel: tpu_custom_call.1
= control target key start
LH: loop header
LB: loop body
LE: loop exit
PB: predicated region body
PF: predicated region fallthrough
CT: control target
= control target key end

     0   :  { %10 = vsyncpa [#allocation3], 0  ;;  %s2664_s0 = inlined_call_operand.hbm [shape: f32[8,768], index: 0, kind: input, shape index: {}]   ;;  %s2665_s1 = inlined_call_operand.hbm [shape: bf16[768,512], index: 1, kind: input, shape index: {}]   ;;  %s2666_s2 = inlined_call_operand.vmem [shape: f32[1,512], index: 2, kind: input, shape index: {}]   ;;  %s2667_s3 = inlined_call_operand.hbm [shape: bf16[512,128], index: 3, kind: input, shape index: {}]   ;;  %s2668_s4 = inlined_call_operand.vmem [shape: f32[1,128], index: 4, kind: input, shape index: {}]   ;;  %s2669_s5 = inlined_call_operand.hbm [shape: f32[8,128], index: 5, kind: output, shape index: {}]  }
   0x1   :  { %11 = vsyncpa [#allocation6], 0 }
   0x2   :  { %12 = vsyncpa [#allocation4], 0  ;;  %s2572_s18 = smov [#allocation5]   ;;  %s2478_s22 = scalar_lea.hbm %s2665_s1, 24576 }
   0x3   :  { %s28_s19 = sshll.u32 %s2572_s18, 4  ;;  %p2479_p0 = scmp.ne.s32.totalorder %s2665_s1, %s2478_s22  ;;  %s29_s19 = int_to_ptr.vmem [resolvable:$true] %s28_s19 }
   0x4   :  { %p2482_p1 = scmp.lt.u32.totalorder %s2478_s22, %s2665_s1 }
   0x6   :  { %p2484_p2 = pnand %p2482_p1, %p2479_p0 }
   0x8   :  { %2487 = shalt.err (!%p2484_p2)
}
   0x9   :  { %s2488_s27 = scalar_lea.vmem %s29_s19, 24576  ;;  %p2493_p4 = scmp.lt.s32.totalorder %s29_s19, %s29_s19 }
   0xa   :  { %p2489_p3 = scmp.ne.s32.totalorder %s29_s19, %s2488_s27  ;;  %p2494_p5 = scmp.lt.s32.totalorder %s2488_s27, %s2488_s27 }
   0xc   :  { %p2495_p6 = por %p2494_p5, %p2493_p4 }
   0xe   :  { %p2496_p7 = pnand %p2495_p6, %p2489_p3 }
  0x10   :  { %2499 = shalt.err (!%p2496_p7)
}
  0x11   :  { %s2573_s28 = smov 256   ;;  %s2574_s29 = smov 16  }
  0x12   :  { %34 = dma.hbm_to_vmem [thread:$0]  %s2665_s1, 24576, %s29_s19, [#allocation6], %s2573_s28, %s2573_s28, %s2574_s29  }
  0x13   :  { %s2575_s7 = smov [#allocation2]   ;;  %s2576_s9 = smov [#allocation7]  }
  0x14   :  { %s19_s8 = sshll.u32 %s2575_s7, 4  ;;  %s42_s10 = sshll.u32 %s2576_s9, 4  ;;  %s20_s8 = int_to_ptr.vmem [resolvable:$true] %s19_s8  ;;  %s43_s10 = int_to_ptr.vmem [resolvable:$true] %s42_s10 }
  0x15   :  { %s2500_s13 = scalar_lea.hbm %s2664_s0, 768 }
  0x16   :  { %p2501_p8 = scmp.ne.s32.totalorder %s2664_s0, %s2500_s13  ;;  %p2504_p9 = scmp.lt.u32.totalorder %s2500_s13, %s2664_s0 }
  0x18   :  { %p2506_p10 = pnand %p2504_p9, %p2501_p8 }
  0x1a   :  { %2509 = shalt.err (!%p2506_p10)
}
  0x1b   :  { %s2510_s1 = scalar_lea.vmem %s20_s8, 768  ;;  %p2515_p12 = scmp.lt.s32.totalorder %s20_s8, %s20_s8 }
  0x1c   :  { %p2511_p11 = scmp.ne.s32.totalorder %s20_s8, %s2510_s1  ;;  %p2516_p13 = scmp.lt.s32.totalorder %s2510_s1, %s2510_s1 }
  0x1e   :  { %p2517_p0 = por %p2516_p13, %p2515_p12 }
  0x20   :  { %p2518_p1 = pnand %p2517_p0, %p2511_p11 }
  0x22   :  { %2521 = shalt.err (!%p2518_p1)
}
  0x23   :  { %22 = dma.hbm_to_vmem [thread:$0]  %s2664_s0, 768, %s20_s8, [#allocation3]  }
  0x24   :  { %s2522_s22 = scalar_lea.hbm %s2667_s3, 4096 }
  0x25   :  { %p2523_p2 = scmp.ne.s32.totalorder %s2667_s3, %s2522_s22  ;;  %p2526_p3 = scmp.lt.u32.totalorder %s2522_s22, %s2667_s3 }
  0x27   :  { %p2528_p4 = pnand %p2526_p3, %p2523_p2 }
  0x29   :  { %2531 = shalt.err (!%p2528_p4)
}
  0x2a   :  { %s2532_s27 = scalar_lea.vmem %s43_s10, 4096  ;;  %p2537_p6 = scmp.lt.s32.totalorder %s43_s10, %s43_s10 }
  0x2b   :  { %p2533_p5 = scmp.ne.s32.totalorder %s43_s10, %s2532_s27  ;;  %p2538_p7 = scmp.lt.s32.totalorder %s2532_s27, %s2532_s27 }
  0x2d   :  { %p2539_p8 = por %p2538_p7, %p2537_p6 }
  0x2f   :  { %p2540_p9 = pnand %p2539_p8, %p2533_p5 }
  0x31   :  { %2543 = shalt.err (!%p2540_p9)
}
  0x32   :  { %s2577_s0 = smov 64   ;;  %s2578_s28 = smov 4  }
  0x33   :  { %48 = dma.hbm_to_vmem [thread:$0]  %s2667_s3, 4096, %s43_s10, [#allocation6], %s2577_s0, %s2577_s0, %s2578_s28  }
  0x34   :  { %2566 = dma.done.wait [#allocation3], 768  }
  0x35   :  { %2567 = vsyncadd [#allocation3], 4294966528 }
  0x36   :  { %2568 = dma.done.wait [#allocation6], 28672  }
  0x37   :  { %2569 = vsyncadd [#allocation6], 4294938624  ;;  %v2158_v0 = vld [vmem:[#allocation5 + $0x4] ss:$16 sps:$4 sm:$0xff]   ;;  %v2160_v1 = vld [vmem:[#allocation5 + $0xc] ss:$16 sps:$4 sm:$0xff]  }
  0x38   :  { %1247 = vmatprep.subr.bf16.mxu0 %v2158_v0  ;;  %v2162_v2 = vld [vmem:[#allocation5] ss:$16 sps:$4 sm:$0xff]   ;;  %v2163_v3 = vld [vmem:[#allocation5 + $0x8] ss:$16 sps:$4 sm:$0xff]   ;;  %1370 = vmatprep.subr.bf16.mxu1 %v2160_v1  ;;  %v2164_v4 = vld [vmem:[#allocation5 + $0x24] ss:$16 sps:$4 sm:$0xff]  }
  0x39   :  { %1248 = vmatpush1.bf16.msra.mxu0 %v2162_v2  ;;  %1371 = vmatpush1.bf16.msra.mxu1 %v2163_v3  ;;  %v2166_v5 = vld [vmem:[#allocation5 + $0x2c] ss:$16 sps:$4 sm:$0xff]   ;;  %v2168_v6 = vld [vmem:[#allocation5 + $0x20] ss:$16 sps:$4 sm:$0xff]   ;;  %v2169_v7 = vld [vmem:[#allocation5 + $0x28] ss:$16 sps:$4 sm:$0xff]  }
  0x3a   :  { %1249 = vmatprep.subr.bf16.mxu0 %v2164_v4  ;;  %1372 = vmatprep.subr.bf16.mxu1 %v2166_v5  ;;  %v2170_v8 = vld [vmem:[#allocation5 + $0x44] ss:$16 sps:$4 sm:$0xff]   ;;  %v2172_v9 = vld [vmem:[#allocation5 + $0x4c] ss:$16 sps:$4 sm:$0xff]   ;;  %v2174_v10 = vld [vmem:[#allocation5 + $0x40] ss:$16 sps:$4 sm:$0xff]  }
  0x3b   :  { %v2175_v11 = vld [vmem:[#allocation5 + $0x48] ss:$16 sps:$4 sm:$0xff]   ;;  %v2176_v12 = vld [vmem:[#allocation5 + $0x64] ss:$16 sps:$4 sm:$0xff]   ;;  %v2178_v13 = vld [vmem:[#allocation5 + $0x6c] ss:$16 sps:$4 sm:$0xff]  }
  0x3c   :  { %v2180_v14 = vld [vmem:[#allocation5 + $0x60] ss:$16 sps:$4 sm:$0xff]   ;;  %v2181_v15 = vld [vmem:[#allocation5 + $0x68] ss:$16 sps:$4 sm:$0xff]   ;;  %v2182_v16 = vld [vmem:[#allocation5 + $0x84] ss:$16 sps:$4 sm:$0xff]  }
  0x3d   :  { %1250 = vmatpush1.bf16.msra.mxu0 %v2168_v6  ;;  %1373 = vmatpush1.bf16.msra.mxu1 %v2169_v7  ;;  %v2184_v17 = vld [vmem:[#allocation5 + $0x8c] ss:$16 sps:$4 sm:$0xff]   ;;  %v2186_v18 = vld [vmem:[#allocation5 + $0x80] ss:$16 sps:$4 sm:$0xff]   ;;  %v2187_v19 = vld [vmem:[#allocation5 + $0x88] ss:$16 sps:$4 sm:$0xff]  }
  0x3e   :  { %1251 = vmatprep.subr.bf16.mxu0 %v2170_v8  ;;  %1374 = vmatprep.subr.bf16.mxu1 %v2172_v9  ;;  %v2188_v20 = vld [vmem:[#allocation5 + $0xa4] ss:$16 sps:$4 sm:$0xff]   ;;  %v2190_v21 = vld [vmem:[#allocation5 + $0xac] ss:$16 sps:$4 sm:$0xff]   ;;  %v2192_v22 = vld [vmem:[#allocation5 + $0xa0] ss:$16 sps:$4 sm:$0xff]  }
  0x3f   :  { %v2193_v23 = vld [vmem:[#allocation5 + $0xa8] ss:$16 sps:$4 sm:$0xff]   ;;  %v2194_v24 = vld [vmem:[#allocation5 + $0xc4] ss:$16 sps:$4 sm:$0xff]   ;;  %v2196_v25 = vld [vmem:[#allocation5 + $0xcc] ss:$16 sps:$4 sm:$0xff]  }
  0x40   :  { %v2198_v26 = vld [vmem:[#allocation5 + $0xc0] ss:$16 sps:$4 sm:$0xff]   ;;  %v2199_v27 = vld [vmem:[#allocation5 + $0xc8] ss:$16 sps:$4 sm:$0xff]   ;;  %v2200_v28 = vld [vmem:[#allocation5 + $0xe4] ss:$16 sps:$4 sm:$0xff]  }
  0x41   :  { %1252 = vmatpush1.bf16.msra.mxu0 %v2174_v10  ;;  %1375 = vmatpush1.bf16.msra.mxu1 %v2175_v11  ;;  %v2202_v29 = vld [vmem:[#allocation5 + $0xec] ss:$16 sps:$4 sm:$0xff]   ;;  %v2204_v30 = vld [vmem:[#allocation5 + $0xe0] ss:$16 sps:$4 sm:$0xff]   ;;  %v2205_v31 = vld [vmem:[#allocation5 + $0xe8] ss:$16 sps:$4 sm:$0xff]  }
  0x42   :  { %1253 = vmatprep.subr.bf16.mxu0 %v2176_v12  ;;  %1376 = vmatprep.subr.bf16.mxu1 %v2178_v13  ;;  %v2206_v32 = vld [vmem:[#allocation5 + $0x104] ss:$16 sps:$4 sm:$0xff]   ;;  %v2208_v33 = vld [vmem:[#allocation5 + $0x10c] ss:$16 sps:$4 sm:$0xff]   ;;  %v2210_v34 = vld [vmem:[#allocation5 + $0x100] ss:$16 sps:$4 sm:$0xff]  }
  0x43   :  { %v2211_v35 = vld [vmem:[#allocation5 + $0x108] ss:$16 sps:$4 sm:$0xff]   ;;  %v2212_v36 = vld [vmem:[#allocation5 + $0x124] ss:$16 sps:$4 sm:$0xff]   ;;  %v2214_v37 = vld [vmem:[#allocation5 + $0x12c] ss:$16 sps:$4 sm:$0xff]  }
  0x44   :  { %v2216_v38 = vld [vmem:[#allocation5 + $0x120] ss:$16 sps:$4 sm:$0xff]   ;;  %v2217_v39 = vld [vmem:[#allocation5 + $0x128] ss:$16 sps:$4 sm:$0xff]   ;;  %v2218_v40 = vld [vmem:[#allocation5 + $0x144] ss:$16 sps:$4 sm:$0xff]  }
  0x45   :  { %1254 = vmatpush1.bf16.msra.mxu0 %v2180_v14  ;;  %1377 = vmatpush1.bf16.msra.mxu1 %v2181_v15  ;;  %v2220_v41 = vld [vmem:[#allocation5 + $0x14c] ss:$16 sps:$4 sm:$0xff]   ;;  %v2222_v42 = vld [vmem:[#allocation5 + $0x140] ss:$16 sps:$4 sm:$0xff]   ;;  %v2223_v43 = vld [vmem:[#allocation5 + $0x148] ss:$16 sps:$4 sm:$0xff]  }
  0x46   :  { %1255 = vmatprep.subr.bf16.mxu0 %v2182_v16  ;;  %1378 = vmatprep.subr.bf16.mxu1 %v2184_v17  ;;  %v2224_v44 = vld [vmem:[#allocation5 + $0x164] ss:$16 sps:$4 sm:$0xff]   ;;  %v2226_v45 = vld [vmem:[#allocation5 + $0x16c] ss:$16 sps:$4 sm:$0xff]   ;;  %v2228_v47 = vld [vmem:[#allocation5 + $0x160] ss:$16 sps:$4 sm:$0xff]  }
  0x47   :  { %v62_v46 = vld [vmem:[#allocation2 + $0x8] sm:$0xff]  ;;  %v2230_v50 = vld [vmem:[#allocation5 + $0x184] ss:$16 sps:$4 sm:$0xff]   ;;  %v2234_v52 = vld [vmem:[#allocation5 + $0x180] ss:$16 sps:$4 sm:$0xff]   ;;  %s2579_s8 = smov [#allocation8]  }
  0x48   :  { %v68_v48 = vpack.c.bf16 %v62_v46, %v62_v46  ;;  %v2229_v49 = vld [vmem:[#allocation5 + $0x168] ss:$16 sps:$4 sm:$0xff]   ;;  %v2232_v51 = vld [vmem:[#allocation5 + $0x18c] ss:$16 sps:$4 sm:$0xff]   ;;  %v2236_v54 = vld [vmem:[#allocation5 + $0x1a4] ss:$16 sps:$4 sm:$0xff]  }
  0x49   :  { %1256 = vmatpush1.bf16.msra.mxu0 %v2186_v18  ;;  %1379 = vmatpush1.bf16.msra.mxu1 %v2187_v19  ;;  %v2235_v53 = vld [vmem:[#allocation5 + $0x188] ss:$16 sps:$4 sm:$0xff]   ;;  %v2238_v55 = vld [vmem:[#allocation5 + $0x1ac] ss:$16 sps:$4 sm:$0xff]   ;;  %v2240_v56 = vld [vmem:[#allocation5 + $0x1a0] ss:$16 sps:$4 sm:$0xff]  }
  0x4a   :  { %1257 = vmatprep.subr.bf16.mxu0 %v2188_v20  ;;  %1380 = vmatprep.subr.bf16.mxu1 %v2190_v21  ;;  %v2241_v57 = vld [vmem:[#allocation5 + $0x1a8] ss:$16 sps:$4 sm:$0xff]   ;;  %v2242_v58 = vld [vmem:[#allocation5 + $0x1c4] ss:$16 sps:$4 sm:$0xff]   ;;  %v2244_v59 = vld [vmem:[#allocation5 + $0x1cc] ss:$16 sps:$4 sm:$0xff]  }
  0x4b   :  { %1279 = vmatprep.mubr.bf16.mxu0 %v68_v48  ;;  %1402 = vmatprep.mubr.bf16.mxu1 %v68_v48  ;;  %v2246_v60 = vld [vmem:[#allocation5 + $0x1c0] ss:$16 sps:$4 sm:$0xff]   ;;  %v2247_v61 = vld [vmem:[#allocation5 + $0x1c8] ss:$16 sps:$4 sm:$0xff]   ;;  %v2248_v62 = vld [vmem:[#allocation5 + $0x1e4] ss:$16 sps:$4 sm:$0xff]  }
  0x4c   :  { %v2250_v63 = vld [vmem:[#allocation5 + $0x1ec] ss:$16 sps:$4 sm:$0xff]   ;;  %v2252_v0 = vld [vmem:[#allocation5 + $0x1e0] ss:$16 sps:$4 sm:$0xff]   ;;  %v2253_v1 = vld [vmem:[#allocation5 + $0x1e8] ss:$16 sps:$4 sm:$0xff]  }
  0x4d   :  { %1258 = vmatpush1.bf16.msra.mxu0 %v2192_v22  ;;  %1381 = vmatpush1.bf16.msra.mxu1 %v2193_v23  ;;  %v61_v2 = vld [vmem:[#allocation2] sm:$0xff]  ;;  %v2259_v4 = vld [vmem:[#allocation5 + $0x20c] ss:$16 sps:$4 sm:$0xff]   ;;  %v2257_v7 = vld [vmem:[#allocation5 + $0x208] ss:$16 sps:$4 sm:$0xff]   ;;  %s1851_s9 = sshll.u32 %s2579_s8, 4  ;;  %s1852_s9 = int_to_ptr.vmem [resolvable:$true] %s1851_s9 }
  0x4e   :  { %1259 = vmatprep.subr.bf16.mxu0 %v2194_v24  ;;  %1382 = vmatprep.subr.bf16.mxu1 %v2196_v25  ;;  %v2256_v3 = vld [vmem:[#allocation5 + $0x204] ss:$16 sps:$4 sm:$0xff]   ;;  %v67_v5 = vpack.c.bf16 %v61_v2, %v61_v2  ;;  %v2254_v6 = vld [vmem:[#allocation5 + $0x200] ss:$16 sps:$4 sm:$0xff]   ;;  %v2265_v9 = vld [vmem:[#allocation5 + $0x22c] ss:$16 sps:$4 sm:$0xff]   ;;  %p2549_p11 = scmp.lt.s32.totalorder %s1852_s9, %s1852_s9 }
  0x4f   :  { %v2262_v8 = vld [vmem:[#allocation5 + $0x224] ss:$16 sps:$4 sm:$0xff]   ;;  %v2260_v10 = vld [vmem:[#allocation5 + $0x220] ss:$16 sps:$4 sm:$0xff]   ;;  %v2263_v11 = vld [vmem:[#allocation5 + $0x228] ss:$16 sps:$4 sm:$0xff]  }
  0x50   :  { %v2268_v12 = vld [vmem:[#allocation5 + $0x244] ss:$16 sps:$4 sm:$0xff]   ;;  %v2271_v13 = vld [vmem:[#allocation5 + $0x24c] ss:$16 sps:$4 sm:$0xff]   ;;  %v2266_v14 = vld [vmem:[#allocation5 + $0x240] ss:$16 sps:$4 sm:$0xff]  }
  0x51   :  { %1260 = vmatpush1.bf16.msra.mxu0 %v2198_v26  ;;  %1383 = vmatpush1.bf16.msra.mxu1 %v2199_v27  ;;  %v2269_v15 = vld [vmem:[#allocation5 + $0x248] ss:$16 sps:$4 sm:$0xff]   ;;  %v2274_v16 = vld [vmem:[#allocation5 + $0x264] ss:$16 sps:$4 sm:$0xff]   ;;  %v2277_v17 = vld [vmem:[#allocation5 + $0x26c] ss:$16 sps:$4 sm:$0xff]  }
  0x52   :  { %1261 = vmatprep.subr.bf16.mxu0 %v2200_v28  ;;  %1384 = vmatprep.subr.bf16.mxu1 %v2202_v29  ;;  %v2272_v18 = vld [vmem:[#allocation5 + $0x260] ss:$16 sps:$4 sm:$0xff]   ;;  %v2275_v19 = vld [vmem:[#allocation5 + $0x268] ss:$16 sps:$4 sm:$0xff]   ;;  %v2280_v20 = vld [vmem:[#allocation5 + $0x284] ss:$16 sps:$4 sm:$0xff]  }
  0x53   :  { %v2283_v21 = vld [vmem:[#allocation5 + $0x28c] ss:$16 sps:$4 sm:$0xff]   ;;  %v2278_v22 = vld [vmem:[#allocation5 + $0x280] ss:$16 sps:$4 sm:$0xff]   ;;  %v2281_v23 = vld [vmem:[#allocation5 + $0x288] ss:$16 sps:$4 sm:$0xff]  }
  0x54   :  { %v2286_v24 = vld [vmem:[#allocation5 + $0x2a4] ss:$16 sps:$4 sm:$0xff]   ;;  %v2289_v25 = vld [vmem:[#allocation5 + $0x2ac] ss:$16 sps:$4 sm:$0xff]   ;;  %v2284_v26 = vld [vmem:[#allocation5 + $0x2a0] ss:$16 sps:$4 sm:$0xff]  }
  0x55   :  { %1262 = vmatpush1.bf16.msra.mxu0 %v2204_v30  ;;  %1385 = vmatpush1.bf16.msra.mxu1 %v2205_v31  ;;  %v2287_v27 = vld [vmem:[#allocation5 + $0x2a8] ss:$16 sps:$4 sm:$0xff]   ;;  %v2292_v28 = vld [vmem:[#allocation5 + $0x2c4] ss:$16 sps:$4 sm:$0xff]   ;;  %v2295_v29 = vld [vmem:[#allocation5 + $0x2cc] ss:$16 sps:$4 sm:$0xff]  }
  0x56   :  { %1263 = vmatprep.subr.bf16.mxu0 %v2206_v32  ;;  %1386 = vmatprep.subr.bf16.mxu1 %v2208_v33  ;;  %v64_v30 = vld [vmem:[#allocation2 + $0x18] sm:$0xff]  ;;  %v2290_v31 = vld [vmem:[#allocation5 + $0x2c0] ss:$16 sps:$4 sm:$0xff]   ;;  %v2316_v46 = vld [vmem:[#allocation5 + $0x344] ss:$16 sps:$4 sm:$0xff]   ;;  %s2544_s10 = scalar_lea.vmem %s1852_s9, 128 }
  0x57   :  { %v70_v32 = vpack.c.bf16 %v64_v30, %v64_v30  ;;  %v2293_v33 = vld [vmem:[#allocation5 + $0x2c8] ss:$16 sps:$4 sm:$0xff]   ;;  %v2314_v48 = vld [vmem:[#allocation5 + $0x340] ss:$16 sps:$4 sm:$0xff]   ;;  %v2346_v2 = vld [vmem:[#allocation5 + $0x3e4] ss:$16 sps:$4 sm:$0xff]   ;;  %p2545_p10 = scmp.ne.s32.totalorder %s1852_s9, %s2544_s10  ;;  %p2550_p12 = scmp.lt.s32.totalorder %s2544_s10, %s2544_s10 }
  0x58   :  { %v2382_v30 = vld [vmem:[#allocation5 + $0x4a4] ss:$16 sps:$4 sm:$0xff]  }
  0x59   :  { %1264 = vmatpush1.bf16.msra.mxu0 %v2210_v34  ;;  %1387 = vmatpush1.bf16.msra.mxu1 %v2211_v35  ;;  %v2298_v34 = vld [vmem:[#allocation5 + $0x2e4] ss:$16 sps:$4 sm:$0xff]   ;;  %v2301_v35 = vld [vmem:[#allocation5 + $0x2ec] ss:$16 sps:$4 sm:$0xff]   ;;  %p2551_p13 = por %p2550_p12, %p2549_p11 }
  0x5a   :  { %1265 = vmatprep.subr.bf16.mxu0 %v2212_v36  ;;  %1388 = vmatprep.subr.bf16.mxu1 %v2214_v37  ;;  %v2296_v36 = vld [vmem:[#allocation5 + $0x2e0] ss:$16 sps:$4 sm:$0xff]   ;;  %v2299_v37 = vld [vmem:[#allocation5 + $0x2e8] ss:$16 sps:$4 sm:$0xff]  }
  0x5b   :  { %p2552_p0 = pnand %p2551_p13, %p2545_p10 }
  0x5d   :  { %1266 = vmatpush1.bf16.msra.mxu0 %v2216_v38  ;;  %1389 = vmatpush1.bf16.msra.mxu1 %v2217_v39  ;;  %v2304_v38 = vld [vmem:[#allocation5 + $0x304] ss:$16 sps:$4 sm:$0xff]   ;;  %v2307_v39 = vld [vmem:[#allocation5 + $0x30c] ss:$16 sps:$4 sm:$0xff]  }
  0x5e   :  { %1267 = vmatprep.subr.bf16.mxu0 %v2218_v40  ;;  %1390 = vmatprep.subr.bf16.mxu1 %v2220_v41  ;;  %v2302_v40 = vld [vmem:[#allocation5 + $0x300] ss:$16 sps:$4 sm:$0xff]   ;;  %v2305_v41 = vld [vmem:[#allocation5 + $0x308] ss:$16 sps:$4 sm:$0xff]  }
  0x61   :  { %1268 = vmatpush1.bf16.msra.mxu0 %v2222_v42  ;;  %1391 = vmatpush1.bf16.msra.mxu1 %v2223_v43  ;;  %v2310_v42 = vld [vmem:[#allocation5 + $0x324] ss:$16 sps:$4 sm:$0xff]   ;;  %v2313_v43 = vld [vmem:[#allocation5 + $0x32c] ss:$16 sps:$4 sm:$0xff]  }
  0x62   :  { %1269 = vmatprep.subr.bf16.mxu0 %v2224_v44  ;;  %1392 = vmatprep.subr.bf16.mxu1 %v2226_v45  ;;  %v2308_v44 = vld [vmem:[#allocation5 + $0x320] ss:$16 sps:$4 sm:$0xff]   ;;  %v2311_v45 = vld [vmem:[#allocation5 + $0x328] ss:$16 sps:$4 sm:$0xff]  }
  0x65   :  { %1270 = vmatpush1.bf16.msra.mxu0 %v2228_v47  ;;  %1393 = vmatpush1.bf16.msra.mxu1 %v2229_v49  ;;  %v2319_v47 = vld [vmem:[#allocation5 + $0x34c] ss:$16 sps:$4 sm:$0xff]   ;;  %v2317_v49 = vld [vmem:[#allocation5 + $0x348] ss:$16 sps:$4 sm:$0xff]  }
  0x66   :  { %1271 = vmatprep.subr.bf16.mxu0 %v2230_v50  ;;  %1394 = vmatprep.subr.bf16.mxu1 %v2232_v51  ;;  %v2322_v50 = vld [vmem:[#allocation5 + $0x364] ss:$16 sps:$4 sm:$0xff]   ;;  %v2325_v51 = vld [vmem:[#allocation5 + $0x36c] ss:$16 sps:$4 sm:$0xff]  }
  0x69   :  { %1272 = vmatpush1.bf16.msra.mxu0 %v2234_v52  ;;  %1395 = vmatpush1.bf16.msra.mxu1 %v2235_v53  ;;  %v2320_v52 = vld [vmem:[#allocation5 + $0x360] ss:$16 sps:$4 sm:$0xff]   ;;  %v2323_v53 = vld [vmem:[#allocation5 + $0x368] ss:$16 sps:$4 sm:$0xff]  }
  0x6a   :  { %1273 = vmatprep.subr.bf16.mxu0 %v2236_v54  ;;  %1396 = vmatprep.subr.bf16.mxu1 %v2238_v55  ;;  %v2328_v54 = vld [vmem:[#allocation5 + $0x384] ss:$16 sps:$4 sm:$0xff]   ;;  %v2331_v55 = vld [vmem:[#allocation5 + $0x38c] ss:$16 sps:$4 sm:$0xff]  }
  0x6d   :  { %1274 = vmatpush1.bf16.msra.mxu0 %v2240_v56  ;;  %1397 = vmatpush1.bf16.msra.mxu1 %v2241_v57  ;;  %v2326_v56 = vld [vmem:[#allocation5 + $0x380] ss:$16 sps:$4 sm:$0xff]   ;;  %v2329_v57 = vld [vmem:[#allocation5 + $0x388] ss:$16 sps:$4 sm:$0xff]  }
  0x6e   :  { %1275 = vmatprep.subr.bf16.mxu0 %v2242_v58  ;;  %1398 = vmatprep.subr.bf16.mxu1 %v2244_v59  ;;  %v2334_v58 = vld [vmem:[#allocation5 + $0x3a4] ss:$16 sps:$4 sm:$0xff]   ;;  %v2337_v59 = vld [vmem:[#allocation5 + $0x3ac] ss:$16 sps:$4 sm:$0xff]  }
  0x71   :  { %1276 = vmatpush1.bf16.msra.mxu0 %v2246_v60  ;;  %1399 = vmatpush1.bf16.msra.mxu1 %v2247_v61  ;;  %v2332_v60 = vld [vmem:[#allocation5 + $0x3a0] ss:$16 sps:$4 sm:$0xff]   ;;  %v2335_v61 = vld [vmem:[#allocation5 + $0x3a8] ss:$16 sps:$4 sm:$0xff]  }
  0x72   :  { %1277 = vmatprep.subr.bf16.mxu0 %v2248_v62  ;;  %1400 = vmatprep.subr.bf16.mxu1 %v2250_v63  ;;  %v2340_v62 = vld [vmem:[#allocation5 + $0x3c4] ss:$16 sps:$4 sm:$0xff]   ;;  %v2343_v63 = vld [vmem:[#allocation5 + $0x3cc] ss:$16 sps:$4 sm:$0xff]  }
  0x75   :  { %1278 = vmatpush1.bf16.msra.mxu0 %v2252_v0  ;;  %1401 = vmatpush1.bf16.msra.mxu1 %v2253_v1  ;;  %v2338_v0 = vld [vmem:[#allocation5 + $0x3c0] ss:$16 sps:$4 sm:$0xff]   ;;  %v2341_v1 = vld [vmem:[#allocation5 + $0x3c8] ss:$16 sps:$4 sm:$0xff]  }
  0x76   :  { %1288 = vmatprep.subr.bf16.mxu0 %v2256_v3  ;;  %1411 = vmatprep.subr.bf16.mxu1 %v2259_v4  ;;  %v2349_v3 = vld [vmem:[#allocation5 + $0x3ec] ss:$16 sps:$4 sm:$0xff]   ;;  %v2344_v4 = vld [vmem:[#allocation5 + $0x3e0] ss:$16 sps:$4 sm:$0xff]  }
  0x78   :  { %1280 = vmatmul.mubr.bf16.vlgmr.msra.gmra.mrb[0].mxu0 %v67_v5  ;;  %1403 = vmatmul.mubr.bf16.vlgmr.msra.gmra.mrb[0].mxu1 %v67_v5  ;;  %v2347_v5 = vld [vmem:[#allocation5 + $0x3e8] ss:$16 sps:$4 sm:$0xff]  }
  0x79   :  { %1289 = vmatpush1.bf16.msra.mxu0 %v2254_v6  ;;  %1412 = vmatpush1.bf16.msra.mxu1 %v2257_v7  ;;  %v2352_v6 = vld [vmem:[#allocation5 + $0x404] ss:$16 sps:$4 sm:$0xff]  }
  0x7a   :  { %1290 = vmatprep.subr.bf16.mxu0 %v2262_v8  ;;  %1413 = vmatprep.subr.bf16.mxu1 %v2265_v9  ;;  %v63_v7 = vld [vmem:[#allocation2 + $0x10] sm:$0xff]  ;;  %v2355_v8 = vld [vmem:[#allocation5 + $0x40c] ss:$16 sps:$4 sm:$0xff]  }
  0x7b   :  { %1320 = vmatprep.mubr.bf16.mxu0 %v70_v32  ;;  %1443 = vmatprep.mubr.bf16.mxu1 %v70_v32  ;;  %v2350_v9 = vld [vmem:[#allocation5 + $0x400] ss:$16 sps:$4 sm:$0xff]  }
  0x7c   :  { %v2380_v32 = vld [vmem:[#allocation5 + $0x4a0] ss:$16 sps:$4 sm:$0xff]  }
  0x7d   :  { %1291 = vmatpush1.bf16.msra.mxu0 %v2260_v10  ;;  %1414 = vmatpush1.bf16.msra.mxu1 %v2263_v11  ;;  %v69_v10 = vpack.c.bf16 %v63_v7, %v63_v7  ;;  %v2353_v11 = vld [vmem:[#allocation5 + $0x408] ss:$16 sps:$4 sm:$0xff]   ;;  %v2445_v7 = vld [vmem:[#allocation5 + $0x5ec] ss:$16 sps:$4 sm:$0xff]  }
  0x7e   :  { %1292 = vmatprep.subr.bf16.mxu0 %v2268_v12  ;;  %1415 = vmatprep.subr.bf16.mxu1 %v2271_v13  ;;  %v2358_v12 = vld [vmem:[#allocation5 + $0x424] ss:$16 sps:$4 sm:$0xff]   ;;  %v2361_v13 = vld [vmem:[#allocation5 + $0x42c] ss:$16 sps:$4 sm:$0xff]  }
  0x81   :  { %1293 = vmatpush1.bf16.msra.mxu0 %v2266_v14  ;;  %1416 = vmatpush1.bf16.msra.mxu1 %v2269_v15  ;;  %v66_v14 = vld [vmem:[#allocation2 + $0x28] sm:$0xff]  ;;  %v2356_v15 = vld [vmem:[#allocation5 + $0x420] ss:$16 sps:$4 sm:$0xff]  }
  0x82   :  { %1294 = vmatprep.subr.bf16.mxu0 %v2274_v16  ;;  %1417 = vmatprep.subr.bf16.mxu1 %v2277_v17  ;;  %v72_v16 = vpack.c.bf16 %v66_v14, %v66_v14  ;;  %v2359_v17 = vld [vmem:[#allocation5 + $0x428] ss:$16 sps:$4 sm:$0xff]   ;;  %v2448_v14 = vld [vmem:[#allocation7] sm:$0xff]  }
  0x85   :  { %1295 = vmatpush1.bf16.msra.mxu0 %v2272_v18  ;;  %1418 = vmatpush1.bf16.msra.mxu1 %v2275_v19  ;;  %v2364_v18 = vld [vmem:[#allocation5 + $0x444] ss:$16 sps:$4 sm:$0xff]   ;;  %v2367_v19 = vld [vmem:[#allocation5 + $0x44c] ss:$16 sps:$4 sm:$0xff]  }
  0x86   :  { %1296 = vmatprep.subr.bf16.mxu0 %v2280_v20  ;;  %1419 = vmatprep.subr.bf16.mxu1 %v2283_v21  ;;  %v2362_v20 = vld [vmem:[#allocation5 + $0x440] ss:$16 sps:$4 sm:$0xff]   ;;  %v2365_v21 = vld [vmem:[#allocation5 + $0x448] ss:$16 sps:$4 sm:$0xff]  }
  0x89   :  { %1297 = vmatpush1.bf16.msra.mxu0 %v2278_v22  ;;  %1420 = vmatpush1.bf16.msra.mxu1 %v2281_v23  ;;  %v2370_v22 = vld [vmem:[#allocation5 + $0x464] ss:$16 sps:$4 sm:$0xff]   ;;  %v2373_v23 = vld [vmem:[#allocation5 + $0x46c] ss:$16 sps:$4 sm:$0xff]  }
  0x8a   :  { %1298 = vmatprep.subr.bf16.mxu0 %v2286_v24  ;;  %1421 = vmatprep.subr.bf16.mxu1 %v2289_v25  ;;  %v2368_v24 = vld [vmem:[#allocation5 + $0x460] ss:$16 sps:$4 sm:$0xff]   ;;  %v2371_v25 = vld [vmem:[#allocation5 + $0x468] ss:$16 sps:$4 sm:$0xff]  }
  0x8d   :  { %1299 = vmatpush1.bf16.msra.mxu0 %v2284_v26  ;;  %1422 = vmatpush1.bf16.msra.mxu1 %v2287_v27  ;;  %v2376_v26 = vld [vmem:[#allocation5 + $0x484] ss:$16 sps:$4 sm:$0xff]   ;;  %v2379_v27 = vld [vmem:[#allocation5 + $0x48c] ss:$16 sps:$4 sm:$0xff]  }
  0x8e   :  { %1300 = vmatprep.subr.bf16.mxu0 %v2292_v28  ;;  %1423 = vmatprep.subr.bf16.mxu1 %v2295_v29  ;;  %v2374_v28 = vld [vmem:[#allocation5 + $0x480] ss:$16 sps:$4 sm:$0xff]   ;;  %v2377_v29 = vld [vmem:[#allocation5 + $0x488] ss:$16 sps:$4 sm:$0xff]  }
  0x91   :  { %1301 = vmatpush1.bf16.msra.mxu0 %v2290_v31  ;;  %1424 = vmatpush1.bf16.msra.mxu1 %v2293_v33  ;;  %v2385_v31 = vld [vmem:[#allocation5 + $0x4ac] ss:$16 sps:$4 sm:$0xff]   ;;  %v2383_v33 = vld [vmem:[#allocation5 + $0x4a8] ss:$16 sps:$4 sm:$0xff]  }
  0x92   :  { %1302 = vmatprep.subr.bf16.mxu0 %v2298_v34  ;;  %1425 = vmatprep.subr.bf16.mxu1 %v2301_v35  ;;  %v2388_v34 = vld [vmem:[#allocation5 + $0x4c4] ss:$16 sps:$4 sm:$0xff]   ;;  %v2391_v35 = vld [vmem:[#allocation5 + $0x4cc] ss:$16 sps:$4 sm:$0xff]  }
  0x95   :  { %1303 = vmatpush1.bf16.msra.mxu0 %v2296_v36  ;;  %1426 = vmatpush1.bf16.msra.mxu1 %v2299_v37  ;;  %v2386_v36 = vld [vmem:[#allocation5 + $0x4c0] ss:$16 sps:$4 sm:$0xff]   ;;  %v2389_v37 = vld [vmem:[#allocation5 + $0x4c8] ss:$16 sps:$4 sm:$0xff]  }
  0x96   :  { %1304 = vmatprep.subr.bf16.mxu0 %v2304_v38  ;;  %1427 = vmatprep.subr.bf16.mxu1 %v2307_v39  ;;  %v2394_v38 = vld [vmem:[#allocation5 + $0x4e4] ss:$16 sps:$4 sm:$0xff]   ;;  %v2397_v39 = vld [vmem:[#allocation5 + $0x4ec] ss:$16 sps:$4 sm:$0xff]  }
  0x99   :  { %1305 = vmatpush1.bf16.msra.mxu0 %v2302_v40  ;;  %1428 = vmatpush1.bf16.msra.mxu1 %v2305_v41  ;;  %v2392_v40 = vld [vmem:[#allocation5 + $0x4e0] ss:$16 sps:$4 sm:$0xff]   ;;  %v2395_v41 = vld [vmem:[#allocation5 + $0x4e8] ss:$16 sps:$4 sm:$0xff]  }
  0x9a   :  { %1306 = vmatprep.subr.bf16.mxu0 %v2310_v42  ;;  %1429 = vmatprep.subr.bf16.mxu1 %v2313_v43  ;;  %v2400_v42 = vld [vmem:[#allocation5 + $0x504] ss:$16 sps:$4 sm:$0xff]   ;;  %v2403_v43 = vld [vmem:[#allocation5 + $0x50c] ss:$16 sps:$4 sm:$0xff]  }
  0x9d   :  { %1307 = vmatpush1.bf16.msra.mxu0 %v2308_v44  ;;  %1430 = vmatpush1.bf16.msra.mxu1 %v2311_v45  ;;  %v2398_v44 = vld [vmem:[#allocation5 + $0x500] ss:$16 sps:$4 sm:$0xff]   ;;  %v2401_v45 = vld [vmem:[#allocation5 + $0x508] ss:$16 sps:$4 sm:$0xff]  }
  0x9e   :  { %1308 = vmatprep.subr.bf16.mxu0 %v2316_v46  ;;  %1431 = vmatprep.subr.bf16.mxu1 %v2319_v47  ;;  %v2406_v46 = vld [vmem:[#allocation5 + $0x524] ss:$16 sps:$4 sm:$0xff]   ;;  %v2409_v47 = vld [vmem:[#allocation5 + $0x52c] ss:$16 sps:$4 sm:$0xff]  }
  0xa1   :  { %1309 = vmatpush1.bf16.msra.mxu0 %v2314_v48  ;;  %1432 = vmatpush1.bf16.msra.mxu1 %v2317_v49  ;;  %v2404_v48 = vld [vmem:[#allocation5 + $0x520] ss:$16 sps:$4 sm:$0xff]   ;;  %v2407_v49 = vld [vmem:[#allocation5 + $0x528] ss:$16 sps:$4 sm:$0xff]  }
  0xa2   :  { %1310 = vmatprep.subr.bf16.mxu0 %v2322_v50  ;;  %1433 = vmatprep.subr.bf16.mxu1 %v2325_v51  ;;  %v2412_v50 = vld [vmem:[#allocation5 + $0x544] ss:$16 sps:$4 sm:$0xff]   ;;  %v2415_v51 = vld [vmem:[#allocation5 + $0x54c] ss:$16 sps:$4 sm:$0xff]  }
  0xa5   :  { %1311 = vmatpush1.bf16.msra.mxu0 %v2320_v52  ;;  %1434 = vmatpush1.bf16.msra.mxu1 %v2323_v53  ;;  %v2410_v52 = vld [vmem:[#allocation5 + $0x540] ss:$16 sps:$4 sm:$0xff]   ;;  %v2413_v53 = vld [vmem:[#allocation5 + $0x548] ss:$16 sps:$4 sm:$0xff]  }
  0xa6   :  { %1312 = vmatprep.subr.bf16.mxu0 %v2328_v54  ;;  %1435 = vmatprep.subr.bf16.mxu1 %v2331_v55  ;;  %v2418_v54 = vld [vmem:[#allocation5 + $0x564] ss:$16 sps:$4 sm:$0xff]   ;;  %v2421_v55 = vld [vmem:[#allocation5 + $0x56c] ss:$16 sps:$4 sm:$0xff]  }
  0xa9   :  { %1313 = vmatpush1.bf16.msra.mxu0 %v2326_v56  ;;  %1436 = vmatpush1.bf16.msra.mxu1 %v2329_v57  ;;  %v2416_v56 = vld [vmem:[#allocation5 + $0x560] ss:$16 sps:$4 sm:$0xff]   ;;  %v2419_v57 = vld [vmem:[#allocation5 + $0x568] ss:$16 sps:$4 sm:$0xff]  }
  0xaa   :  { %1314 = vmatprep.subr.bf16.mxu0 %v2334_v58  ;;  %1437 = vmatprep.subr.bf16.mxu1 %v2337_v59  ;;  %v2424_v58 = vld [vmem:[#allocation5 + $0x584] ss:$16 sps:$4 sm:$0xff]   ;;  %v2427_v59 = vld [vmem:[#allocation5 + $0x58c] ss:$16 sps:$4 sm:$0xff]  }
  0xad   :  { %1315 = vmatpush1.bf16.msra.mxu0 %v2332_v60  ;;  %1438 = vmatpush1.bf16.msra.mxu1 %v2335_v61  ;;  %v2422_v60 = vld [vmem:[#allocation5 + $0x580] ss:$16 sps:$4 sm:$0xff]   ;;  %v2425_v61 = vld [vmem:[#allocation5 + $0x588] ss:$16 sps:$4 sm:$0xff]  }
  0xae   :  { %1316 = vmatprep.subr.bf16.mxu0 %v2340_v62  ;;  %1439 = vmatprep.subr.bf16.mxu1 %v2343_v63  ;;  %v2430_v62 = vld [vmem:[#allocation5 + $0x5a4] ss:$16 sps:$4 sm:$0xff]   ;;  %v2433_v63 = vld [vmem:[#allocation5 + $0x5ac] ss:$16 sps:$4 sm:$0xff]  }
  0xb1   :  { %1317 = vmatpush1.bf16.msra.mxu0 %v2338_v0  ;;  %1440 = vmatpush1.bf16.msra.mxu1 %v2341_v1  ;;  %v2428_v0 = vld [vmem:[#allocation5 + $0x5a0] ss:$16 sps:$4 sm:$0xff]   ;;  %v2431_v1 = vld [vmem:[#allocation5 + $0x5a8] ss:$16 sps:$4 sm:$0xff]  }
  0xb2   :  { %1318 = vmatprep.subr.bf16.mxu0 %v2346_v2  ;;  %1441 = vmatprep.subr.bf16.mxu1 %v2349_v3  ;;  %v2436_v2 = vld [vmem:[#allocation5 + $0x5c4] ss:$16 sps:$4 sm:$0xff]   ;;  %v2439_v3 = vld [vmem:[#allocation5 + $0x5cc] ss:$16 sps:$4 sm:$0xff]  }
  0xb5   :  { %1319 = vmatpush1.bf16.msra.mxu0 %v2344_v4  ;;  %1442 = vmatpush1.bf16.msra.mxu1 %v2347_v5  ;;  %v2434_v4 = vld [vmem:[#allocation5 + $0x5c0] ss:$16 sps:$4 sm:$0xff]   ;;  %v2437_v5 = vld [vmem:[#allocation5 + $0x5c8] ss:$16 sps:$4 sm:$0xff]  }
  0xb6   :  { %1329 = vmatprep.subr.bf16.mxu0 %v2352_v6  ;;  %1452 = vmatprep.subr.bf16.mxu1 %v2355_v8  ;;  %v2442_v6 = vld [vmem:[#allocation5 + $0x5e4] ss:$16 sps:$4 sm:$0xff]   ;;  %v2440_v8 = vld [vmem:[#allocation5 + $0x5e0] ss:$16 sps:$4 sm:$0xff]  }
  0xb8   :  { %1321 = vmatmul.mubr.bf16.vlgmr.msra.gmra.mrb[0].mxu0 %v69_v10  ;;  %1444 = vmatmul.mubr.bf16.vlgmr.msra.gmra.mrb[0].mxu1 %v69_v10  ;;  %v65_v10 = vld [vmem:[#allocation2 + $0x20] sm:$0xff] }
  0xb9   :  { %1330 = vmatpush1.bf16.msra.mxu0 %v2350_v9  ;;  %1453 = vmatpush1.bf16.msra.mxu1 %v2353_v11  ;;  %v2443_v9 = vld [vmem:[#allocation5 + $0x5e8] ss:$16 sps:$4 sm:$0xff]   ;;  %v2446_v11 = vld [vmem:[#allocation7 + $0x40] sm:$0xff]  }
  0xba   :  { %1331 = vmatprep.subr.bf16.mxu0 %v2358_v12  ;;  %1454 = vmatprep.subr.bf16.mxu1 %v2361_v13  ;;  %v2447_v12 = vld [vmem:[#allocation7 + $0xc0] sm:$0xff]   ;;  %v71_v13 = vpack.c.bf16 %v65_v10, %v65_v10 }
  0xbb   :  { %1361 = vmatprep.mubr.bf16.mxu0 %v72_v16  ;;  %1484 = vmatprep.mubr.bf16.mxu1 %v72_v16  ;;  %v2450_v16 = vld [vmem:[#allocation7 + $0x48] sm:$0xff]  }
  0xbd   :  { %1332 = vmatpush1.bf16.msra.mxu0 %v2356_v15  ;;  %1455 = vmatpush1.bf16.msra.mxu1 %v2359_v17  ;;  %v2449_v15 = vld [vmem:[#allocation7 + $0x80] sm:$0xff]   ;;  %v2451_v17 = vld [vmem:[#allocation7 + $0xc8] sm:$0xff]  }
  0xbe   :  { %1333 = vmatprep.subr.bf16.mxu0 %v2364_v18  ;;  %1456 = vmatprep.subr.bf16.mxu1 %v2367_v19  ;;  %v2452_v18 = vld [vmem:[#allocation7 + $0x8] sm:$0xff]  }
  0xbf   :  { %v2453_v19 = vld [vmem:[#allocation7 + $0x88] sm:$0xff]  }
  0xc1   :  { %1334 = vmatpush1.bf16.msra.mxu0 %v2362_v20  ;;  %1457 = vmatpush1.bf16.msra.mxu1 %v2365_v21  ;;  %v2454_v20 = vld [vmem:[#allocation7 + $0x50] sm:$0xff]  }
  0xc2   :  { %1335 = vmatprep.subr.bf16.mxu0 %v2370_v22  ;;  %1458 = vmatprep.subr.bf16.mxu1 %v2373_v23  ;;  %v2455_v21 = vld [vmem:[#allocation7 + $0xd0] sm:$0xff]  }
  0xc3   :  { %v2456_v22 = vld [vmem:[#allocation7 + $0x10] sm:$0xff]  }
  0xc4   :  { %v2457_v23 = vld [vmem:[#allocation7 + $0x90] sm:$0xff]  }
  0xc5   :  { %1336 = vmatpush1.bf16.msra.mxu0 %v2368_v24  ;;  %1459 = vmatpush1.bf16.msra.mxu1 %v2371_v25  ;;  %v2458_v24 = vld [vmem:[#allocation7 + $0x58] sm:$0xff]  }
  0xc6   :  { %1337 = vmatprep.subr.bf16.mxu0 %v2376_v26  ;;  %1460 = vmatprep.subr.bf16.mxu1 %v2379_v27  ;;  %v2459_v25 = vld [vmem:[#allocation7 + $0xd8] sm:$0xff]  }
  0xc7   :  { %v2460_v26 = vld [vmem:[#allocation7 + $0x18] sm:$0xff]  }
  0xc8   :  { %v2461_v27 = vld [vmem:[#allocation7 + $0x98] sm:$0xff]  }
  0xc9   :  { %1338 = vmatpush1.bf16.msra.mxu0 %v2374_v28  ;;  %1461 = vmatpush1.bf16.msra.mxu1 %v2377_v29  ;;  %v2462_v28 = vld [vmem:[#allocation7 + $0x60] sm:$0xff]  }
  0xca   :  { %1339 = vmatprep.subr.bf16.mxu0 %v2382_v30  ;;  %1462 = vmatprep.subr.bf16.mxu1 %v2385_v31  ;;  %v2463_v29 = vld [vmem:[#allocation7 + $0xe0] sm:$0xff]  }
  0xcb   :  { %v2464_v30 = vld [vmem:[#allocation7 + $0x20] sm:$0xff]  }
  0xcc   :  { %v2465_v31 = vld [vmem:[#allocation7 + $0xa0] sm:$0xff]  }
  0xcd   :  { %1340 = vmatpush1.bf16.msra.mxu0 %v2380_v32  ;;  %1463 = vmatpush1.bf16.msra.mxu1 %v2383_v33  ;;  %v2466_v32 = vld [vmem:[#allocation7 + $0x68] sm:$0xff]  }
  0xce   :  { %1341 = vmatprep.subr.bf16.mxu0 %v2388_v34  ;;  %1464 = vmatprep.subr.bf16.mxu1 %v2391_v35  ;;  %v2467_v33 = vld [vmem:[#allocation7 + $0xe8] sm:$0xff]  }
  0xcf   :  { %v2468_v34 = vld [vmem:[#allocation7 + $0x28] sm:$0xff]  }
  0xd0   :  { %v2469_v35 = vld [vmem:[#allocation7 + $0xa8] sm:$0xff]  }
  0xd1   :  { %1342 = vmatpush1.bf16.msra.mxu0 %v2386_v36  ;;  %1465 = vmatpush1.bf16.msra.mxu1 %v2389_v37  ;;  %v2470_v36 = vld [vmem:[#allocation7 + $0x70] sm:$0xff]  }
  0xd2   :  { %1343 = vmatprep.subr.bf16.mxu0 %v2394_v38  ;;  %1466 = vmatprep.subr.bf16.mxu1 %v2397_v39  ;;  %v2471_v37 = vld [vmem:[#allocation7 + $0xf0] sm:$0xff]  }
  0xd3   :  { %v2472_v38 = vld [vmem:[#allocation7 + $0x30] sm:$0xff]  }
  0xd4   :  { %v2473_v39 = vld [vmem:[#allocation7 + $0xb0] sm:$0xff]  }
  0xd5   :  { %1344 = vmatpush1.bf16.msra.mxu0 %v2392_v40  ;;  %1467 = vmatpush1.bf16.msra.mxu1 %v2395_v41  ;;  %v2474_v40 = vld [vmem:[#allocation7 + $0x78] sm:$0xff]  }
  0xd6   :  { %1345 = vmatprep.subr.bf16.mxu0 %v2400_v42  ;;  %1468 = vmatprep.subr.bf16.mxu1 %v2403_v43  ;;  %v2475_v41 = vld [vmem:[#allocation7 + $0xf8] sm:$0xff]  }
  0xd7   :  { %v2476_v42 = vld [vmem:[#allocation7 + $0x38] sm:$0xff]  }
  0xd8   :  { %v2477_v43 = vld [vmem:[#allocation7 + $0xb8] sm:$0xff]  }
  0xd9   :  { %1346 = vmatpush1.bf16.msra.mxu0 %v2398_v44  ;;  %1469 = vmatpush1.bf16.msra.mxu1 %v2401_v45  ;;  %v267_v44 = vlaneseq }
  0xda   :  { %1347 = vmatprep.subr.bf16.mxu0 %v2406_v46  ;;  %1470 = vmatprep.subr.bf16.mxu1 %v2409_v47 }
  0xdb   :  { %v268_v45 = vshrl.u32 %v267_v44, 7 }
  0xdd   :  { %1348 = vmatpush1.bf16.msra.mxu0 %v2404_v48  ;;  %1471 = vmatpush1.bf16.msra.mxu1 %v2407_v49  ;;  %v269_v46 = vsub.s32 0, %v268_v45  ;;  %v277_v47 = vsub.s32 2, %v268_v45  ;;  %v265_v48 = vld [vmem:[%s2666_s2] sm:$0xf]  ;;  %v273_v49 = vsub.s32 1, %v268_v45 }
  0xde   :  { %1349 = vmatprep.subr.bf16.mxu0 %v2412_v50  ;;  %1472 = vmatprep.subr.bf16.mxu1 %v2415_v51  ;;  %v281_v50 = vsub.s32 3, %v268_v45 }
  0xdf   :  { %v270_v51 = vrot.slane %v265_v48, %v269_v46 }
  0xe1   :  { %1350 = vmatpush1.bf16.msra.mxu0 %v2410_v52  ;;  %1473 = vmatpush1.bf16.msra.mxu1 %v2413_v53  ;;  %v278_v52 = vrot.slane %v265_v48, %v277_v47  ;;  %v274_v53 = vrot.slane %v265_v48, %v273_v49 }
  0xe2   :  { %1351 = vmatprep.subr.bf16.mxu0 %v2418_v54  ;;  %1474 = vmatprep.subr.bf16.mxu1 %v2421_v55  ;;  %v282_v54 = vrot.slane %v265_v48, %v281_v50 }
  0xe5   :  { %1352 = vmatpush1.bf16.msra.mxu0 %v2416_v56  ;;  %1475 = vmatpush1.bf16.msra.mxu1 %v2419_v57 }
  0xe6   :  { %1353 = vmatprep.subr.bf16.mxu0 %v2424_v58  ;;  %1476 = vmatprep.subr.bf16.mxu1 %v2427_v59 }
  0xe9   :  { %1354 = vmatpush1.bf16.msra.mxu0 %v2422_v60  ;;  %1477 = vmatpush1.bf16.msra.mxu1 %v2425_v61 }
  0xea   :  { %1355 = vmatprep.subr.bf16.mxu0 %v2430_v62  ;;  %1478 = vmatprep.subr.bf16.mxu1 %v2433_v63 }
  0xed   :  { %1356 = vmatpush1.bf16.msra.mxu0 %v2428_v0  ;;  %1479 = vmatpush1.bf16.msra.mxu1 %v2431_v1 }
  0xee   :  { %1357 = vmatprep.subr.bf16.mxu0 %v2436_v2  ;;  %1480 = vmatprep.subr.bf16.mxu1 %v2439_v3 }
  0xf1   :  { %1358 = vmatpush1.bf16.msra.mxu0 %v2434_v4  ;;  %1481 = vmatpush1.bf16.msra.mxu1 %v2437_v5 }
  0xf2   :  { %1359 = vmatprep.subr.bf16.mxu0 %v2442_v6  ;;  %1482 = vmatprep.subr.bf16.mxu1 %v2445_v7 }
  0xf5   :  { %1360 = vmatpush1.bf16.msra.mxu0 %v2440_v8  ;;  %1483 = vmatpush1.bf16.msra.mxu1 %v2443_v9 }
  0xf6   :  { %2086 = vmatprep.subr.bf16.mxu0 %v2446_v11  ;;  %2108 = vmatprep.subr.bf16.mxu1 %v2447_v12 }
  0xf8   :  { %1362 = vmatmul.mubr.bf16.vlgmr.msra.gmra.mrb[0].mxu0 %v71_v13  ;;  %1485 = vmatmul.mubr.bf16.vlgmr.msra.gmra.mrb[0].mxu1 %v71_v13  ;;  %v2053_v13 = vld [vmem:[%s2668_s4] ss:$0 sm:$0xff] }
  0xf9   :  { %2087 = vmatpush3.bf16.msra.mxu0 %v2448_v14  ;;  %2109 = vmatpush3.bf16.msra.mxu1 %v2449_v15 }
  0xfa   :  { %2088 = vmatprep.subr.bf16.mxu0 %v2450_v16  ;;  %2110 = vmatprep.subr.bf16.mxu1 %v2451_v17 }
  0xfd   :  { %2089 = vmatpush3.bf16.msra.mxu0 %v2452_v18  ;;  %2111 = vmatpush3.bf16.msra.mxu1 %v2453_v19 }
  0xfe   :  { %2090 = vmatprep.subr.bf16.mxu0 %v2454_v20  ;;  %2112 = vmatprep.subr.bf16.mxu1 %v2455_v21 }
 0x101   :  { %2091 = vmatpush3.bf16.msra.mxu0 %v2456_v22  ;;  %2113 = vmatpush3.bf16.msra.mxu1 %v2457_v23 }
 0x102   :  { %2092 = vmatprep.subr.bf16.mxu0 %v2458_v24  ;;  %2114 = vmatprep.subr.bf16.mxu1 %v2459_v25 }
 0x105   :  { %2093 = vmatpush3.bf16.msra.mxu0 %v2460_v26  ;;  %2115 = vmatpush3.bf16.msra.mxu1 %v2461_v27 }
 0x106   :  { %2094 = vmatprep.subr.bf16.mxu0 %v2462_v28  ;;  %2116 = vmatprep.subr.bf16.mxu1 %v2463_v29 }
 0x109   :  { %2095 = vmatpush3.bf16.msra.mxu0 %v2464_v30  ;;  %2117 = vmatpush3.bf16.msra.mxu1 %v2465_v31 }
 0x10a   :  { %2096 = vmatprep.subr.bf16.mxu0 %v2466_v32  ;;  %2118 = vmatprep.subr.bf16.mxu1 %v2467_v33 }
 0x10d   :  { %2097 = vmatpush3.bf16.msra.mxu0 %v2468_v34  ;;  %2119 = vmatpush3.bf16.msra.mxu1 %v2469_v35 }
 0x10e   :  { %2098 = vmatprep.subr.bf16.mxu0 %v2470_v36  ;;  %2120 = vmatprep.subr.bf16.mxu1 %v2471_v37 }
 0x111   :  { %2099 = vmatpush3.bf16.msra.mxu0 %v2472_v38  ;;  %2121 = vmatpush3.bf16.msra.mxu1 %v2473_v39 }
 0x112   :  { %2100 = vmatprep.subr.bf16.mxu0 %v2474_v40  ;;  %2122 = vmatprep.subr.bf16.mxu1 %v2475_v41 }
 0x115   :  { %2101 = vmatpush3.bf16.msra.mxu0 %v2476_v42  ;;  %2123 = vmatpush3.bf16.msra.mxu1 %v2477_v43 }
 0x1cb   :  { %v1363_v55 = vpop.f32.mrb[0].mxu0  ;;  %v1486_v56 = vpop.f32.mrb[0].mxu1 }
 0x1cc   :  { %v2130_v57 = vadd.f32 %v1363_v55, %v270_v51  ;;  %v2132_v58 = vadd.f32 %v1486_v56, %v278_v52  ;;  %v1365_v59 = vpop.f32.mrb[1].mxu0  ;;  %v1488_v60 = vpop.f32.mrb[1].mxu1 }
 0x1cd   :  { %v2131_v61 = vadd.f32 %v1365_v59, %v274_v53  ;;  %v2133_v62 = vadd.f32 %v1488_v60, %v282_v54  ;;  %v1367_v63 = vpop.f32.mrb[2].mxu0  ;;  %v1490_v0 = vpop.f32.mrb[2].mxu1 }
 0x1ce   :  { %v1493_v1 = vmax.f32 %v2130_v57, 0.0  ;;  %v1495_v2 = vmax.f32 %v2132_v58, 0.0  ;;  %v1368_v3 = vpop.f32.mrb[3].mxu0  ;;  %v1491_v4 = vpop.f32.mrb[3].mxu1 }
 0x1cf   :  { %v1494_v5 = vmax.f32 %v2131_v61, 0.0  ;;  %v1496_v6 = vmax.f32 %v2133_v62, 0.0 }
 0x1d0   :  { %v1497_v9 = vpack.c.bf16 %v1493_v1, %v1493_v1  ;;  %v1499_v10 = vpack.c.bf16 %v1495_v2, %v1495_v2 }
 0x1d1   :  { %v1498_v7 = vpack.c.bf16 %v1494_v5, %v1494_v5  ;;  %v1500_v8 = vpack.c.bf16 %v1496_v6, %v1496_v6 }
 0x1d3   :  { %1796 = vmatprep.mubr.bf16.mxu0 %v1498_v7  ;;  %1836 = vmatprep.mubr.bf16.mxu1 %v1500_v8 }
 0x1d4   :  { %1797 = vmatmul.mubr.bf16.vlgmr.msra.gmra.mrb[4].mxu0 %v1497_v9  ;;  %1837 = vmatmul.mubr.bf16.vlgmr.msra.gmra.mrb[4].mxu1 %v1499_v10 }
 0x2a7   :  { %v2102_v11 = vpop.f32.mrb[4].mxu0  ;;  %v2124_v12 = vpop.f32.mrb[4].mxu1 }
 0x2a8   :  { %v2103_v14 = vpop.f32.mrb[5].mxu0  ;;  %v2125_v15 = vpop.f32.mrb[5].mxu1 }
 0x2a9   :  { %v2104_v16 = vadd.f32 %v2103_v14, %v2102_v11  ;;  %v2126_v17 = vadd.f32 %v2125_v15, %v2124_v12  ;;  %v2105_v18 = vpop.f32.mrb[6].mxu0  ;;  %v2127_v19 = vpop.f32.mrb[6].mxu1 }
 0x2aa   :  { %v2106_v20 = vpop.f32.mrb[7].mxu0  ;;  %v2128_v21 = vpop.f32.mrb[7].mxu1 }
 0x2ab   :  { %v1799_v22 = vadd.f32 %v2104_v16, %v2053_v13 }
 0x2ad   :  { %v1839_v23 = vadd.f32 %v2126_v17, %v1799_v22 }
 0x2af   :  { %1844 = vst [vmem:[#allocation8] sm:$0xff] %v1839_v23 }
 0x2b0   :  { %2555 = shalt.err (!%p2552_p0)
}
 0x2b1   :  { %s2556_s12 = scalar_lea.hbm %s2669_s5, 128 }
 0x2b2   :  { %p2557_p1 = scmp.ne.s32.totalorder %s2669_s5, %s2556_s12  ;;  %p2560_p2 = scmp.lt.u32.totalorder %s2556_s12, %s2669_s5 }
 0x2b4   :  { %p2562_p3 = pnand %p2560_p2, %p2557_p1 }
 0x2b6   :  { %2565 = shalt.err (!%p2562_p3)
}
 0x2b7   :  { %1854 = dma.vmem_to_hbm [thread:$0]  %s1852_s9, 128, %s2669_s5, [#allocation4]  }
 0x2b8   :  { %2570 = dma.done.wait [#allocation4], 128  }
 0x2b9   :  { %2571 = vsyncadd [#allocation4], 4294967168 }
 0x2ba   :  { %1858 = vsyncpa [#allocation3], 1 }
 0x2bb   :  { %1859 = vsyncpa [#allocation6], 1 }
 0x2bc   :  { %1860 = vsyncpa [#allocation4], 1 }

</bundles_post_ra>
